<compile_context>
chip_gen: v7x
topology: tpu7x:2x2x1
jax: 0.10.0
libtpu: 0.0.40
codegen_flags: <defaults>
</compile_context>

<pallas_src>
import functools

import jax
import jax.numpy as jnp
from jax.experimental import pallas as pl
from jax.experimental.pallas import tpu as pltpu

_MIB = 1024 * 1024


def _round_up(x, m):
    return (x + m - 1) // m * m


def _pick_generation_defaults():
    """Per-TPU-generation scoped-VMEM limit and max tile sizes (tm, tn, tk)."""
    cap = None
    try:
        cap = getattr(pltpu.get_tpu_info(), "vmem_capacity_bytes", None)
    except Exception:  # not on a TPU host / API unavailable -> conservative
        cap = None
    if cap is not None and cap >= 100 * _MIB:
        # v5e / v6e: 128 MiB physical VMEM -> bigger tiles, 96 MiB scoped cap.
        return 96 * _MIB, 512, 2048, 2048
    # v7x (64 MiB physical VMEM) or unknown: conservative tiles, 40 MiB cap.
    return 40 * _MIB, 512, 1024, 1024


_VMEM_LIMIT, _TM_DEFAULT, _TN_DEFAULT, _TK_DEFAULT = _pick_generation_defaults()


def _linear_kernel(x_ref, w_ref, b_ref, o_ref, acc_ref):
    # grid = (M/tm, N/tn, K/tk); K (reduction) is the last, "arbitrary" axis.
    # x_ref: (tm, tk) bf16   w_ref: (tk, tn) bf16
    # b_ref: (1, tn)  f32    o_ref: (tm, tn) out dtype   acc_ref: (tm, tn) f32
    k = pl.program_id(2)
    prod = jnp.dot(x_ref[...], w_ref[...], preferred_element_type=jnp.float32)

    @pl.when(k == 0)
    def _():
        # Direct write on the first K step: no zero-fill + read-modify-write.
        acc_ref[...] = prod

    @pl.when(k > 0)
    def _():
        acc_ref[...] += prod

    @pl.when(k == pl.num_programs(2) - 1)
    def _():
        # Lean epilogue: single bias add + cast, lane-dense store.
        o_ref[...] = (acc_ref[...] + b_ref[...]).astype(o_ref.dtype)


@functools.partial(
    jax.jit, static_argnames=("tm", "tn", "tk", "use_xla_fast_path")
)
def linearQ_forward(state, weight_sa, bias, *, tm=None, tn=None, tk=None,
                    use_xla_fast_path=True):
    """y = state @ weight_sa + bias  (== nn.Linear forward).

    state:     (B, S) f32
    weight_sa: (S, A) bf16 -- nn.Linear weight pre-transposed + pre-cast ONCE
                              at init; no per-call HBM transpose or cast.
    bias:      (A,)   f32
    """
    B, S = state.shape
    S2, A = weight_sa.shape
    assert S == S2, "state / weight shape mismatch"
    out_dtype = state.dtype

    tm_max = _TM_DEFAULT if tm is None else tm
    tn_max = _TN_DEFAULT if tn is None else tn
    tk_max = _TK_DEFAULT if tk is None else tk

    Mp8 = _round_up(B, 8)
    Np128 = _round_up(A, 128)
    Kp128 = _round_up(S, 128)

    # Cover the whole (padded) batch with one M tile when it fits: the weight
    # matrix -- the dominant HBM stream -- is then read from HBM exactly once.
    tm_e = Mp8 if Mp8 <= tm_max else tm_max
    tn_e = min(tn_max, Np128)
    tk_e = min(tk_max, Kp128)

    Mp = _round_up(Mp8, tm_e)
    # v7x has 2 TensorCores: if M collapses to one block, keep >=2 blocks on
    # the N ("parallel") axis when possible so both cores get work.
    if Mp // tm_e < 2 and Np128 // tn_e < 2 and Np128 >= 256:
        tn_e = _round_up(-(-Np128 // 2), 128)

    # Belt-and-suspenders: shrink tiles if the double-buffered working set
    # would exceed the per-generation VMEM budget.
    def _footprint(tm_, tn_, tk_):
        x_b = 2 * tm_ * tk_ * 2          # bf16 activations, double-buffered
        w_b = 2 * tk_ * tn_ * 2          # bf16 weights, double-buffered
        b_b = 2 * 1 * tn_ * 4            # f32 bias, double-buffered
        o_b = 2 * tm_ * tn_ * 4          # output, double-buffered
        acc = tm_ * tn_ * 4              # f32 accumulator scratch
        return x_b + w_b + b_b + o_b + acc

    while _footprint(tm_e, tn_e, tk_e) > _VMEM_LIMIT and tk_e > 128:
        tk_e = max(128, _round_up(tk_e // 2, 128))
    while _footprint(tm_e, tn_e, tk_e) > _VMEM_LIMIT and tn_e > 128:
        tn_e = max(128, _round_up(tn_e // 2, 128))

    Np = _round_up(Np128, tn_e)
    Kp = _round_up(Kp128, tk_e)
    grid_m, grid_n, grid_k = Mp // tm_e, Np // tn_e, Kp // tk_e

    x_bf16 = state.astype(jnp.bfloat16)

    # Fast path: at single-tile problem sizes the Pallas call is pure launch +
    # DMA-setup overhead; XLA's fused dot is strictly faster there.
    if use_xla_fast_path and grid_m == 1 and grid_n == 1 and grid_k == 1:
        y = jnp.dot(x_bf16, weight_sa, preferred_element_type=jnp.float32)
        return (y + bias).astype(out_dtype)

    # Pad to exact tile multiples (zero-padding K is numerically exact; padded
    # M rows / N columns are sliced off below).  No-op when already aligned.
    xp = x_bf16 if (Mp == B and Kp == S) else jnp.pad(
        x_bf16, ((0, Mp - B), (0, Kp - S)))
    wp = weight_sa if (Kp == S and Np == A) else jnp.pad(
        weight_sa, ((0, Kp - S), (0, Np - A)))
    bp = (bias if Np == A else jnp.pad(bias, (0, Np - A)))
    bp = bp.astype(jnp.float32).reshape(1, Np)

    out_itemsize = jnp.dtype(out_dtype).itemsize
    cost = pl.CostEstimate(
        flops=2 * Mp * Kp * Np,
        transcendentals=0,
        # Actual streamed bytes: x is re-read once per N tile, w once per M
        # tile; output written once.
        bytes_accessed=(xp.size * 2 * grid_n
                        + wp.size * 2 * grid_m
                        + bp.size * 4 * grid_m
                        + Mp * Np * out_itemsize),
    )

    out_p = pl.pallas_call(
        _linear_kernel,
        out_shape=jax.ShapeDtypeStruct((Mp, Np), out_dtype),
        grid_spec=pltpu.PrefetchScalarGridSpec(
            num_scalar_prefetch=0,
            grid=(grid_m, grid_n, grid_k),
            in_specs=[
                pl.BlockSpec((tm_e, tk_e), lambda i, j, k: (i, k)),
                # TODO(synk): if profiling shows exposed DMA on the weight
                # stream, add pipeline_mode=pl.Buffered(3) on this spec.
                pl.BlockSpec((tk_e, tn_e), lambda i, j, k: (k, j)),
                pl.BlockSpec((1, tn_e), lambda i, j, k: (0, j)),
            ],
            out_specs=pl.BlockSpec((tm_e, tn_e), lambda i, j, k: (i, j)),
            scratch_shapes=[pltpu.VMEM((tm_e, tn_e), jnp.float32)],
        ),
        compiler_params=pltpu.CompilerParams(
            dimension_semantics=("parallel", "parallel", "arbitrary"),
            vmem_limit_bytes=_VMEM_LIMIT,
        ),
        cost_estimate=cost,
    )(xp, wp, bp)

    return out_p[:B, :A]


def init_linearQ_params(key, state_size, action_size):
    """Deterministic init mimicking nn.Linear (uniform +/- 1/sqrt(fan_in)).

    Returns the PyTorch-layout f32 weight (A, S) for reference checking plus
    the one-time transposed + bf16-cast (S, A) copy used by the hot path.
    """
    kw, kb = jax.random.split(key)
    bound = 1.0 / jnp.sqrt(jnp.float32(state_size))
    weight_as = jax.random.uniform(
        kw, (action_size, state_size), jnp.float32, minval=-bound, maxval=bound
    )
    bias = jax.random.uniform(
        kb, (action_size,), jnp.float32, minval=-bound, maxval=bound
    )
    # Layout + dtype conversion happen ONCE, at init (not on the hot path).
    weight_sa = jnp.asarray(weight_as.T, dtype=jnp.bfloat16)
    return weight_as, weight_sa, bias


if __name__ == "__main__":
    key = jax.random.PRNGKey(0)
    k_x, k_p = jax.random.split(key)

    batch, state_size, action_size = 8, 32, 8
    state = jax.random.normal(k_x, (batch, state_size), jnp.float32)
    weight_as, weight_sa, bias = init_linearQ_params(k_p, state_size, action_size)

    # Force the Pallas path (the default wrapper routes this toy, single-tile
    # shape to a plain XLA dot, which is faster at launch-dominated sizes).
    out = linearQ_forward(state, weight_sa, bias, use_xla_fast_path=False)
    jax.block_until_ready(out)

    # Sanity check against the f32 plain-JAX reference (nn.Linear semantics).
    # Tolerance is loosened for the bf16 weight/activation path.
    ref = state @ weight_as.T + bias
    assert out.shape == (batch, action_size)
    assert jnp.allclose(out, ref, atol=5e-2, rtol=5e-2), float(
        jnp.max(jnp.abs(out - ref)))

    # Also exercise the default routing (XLA fast path at this tiny shape).
    out_fast = linearQ_forward(state, weight_sa, bias)
    jax.block_until_ready(out_fast)
    assert jnp.allclose(out_fast, ref, atol=5e-2, rtol=5e-2)

    print("KERNEL_OK")
</pallas_src>

<mosaic_0001>
module attributes {stable_mosaic.version = 11 : i64} {
  func.func @_linear_kernel(%arg0: i32, %arg1: i32, %arg2: i32, %arg3: memref<8x128xbf16, #tpu.memory_space<vmem>>, %arg4: memref<128x128xbf16, #tpu.memory_space<vmem>>, %arg5: memref<1x128xf32, #tpu.memory_space<vmem>>, %arg6: memref<8x128xf32, #tpu.memory_space<vmem>>, %arg7: memref<8x128xf32, #tpu.memory_space<vmem>>) attributes {dimension_semantics = [#tpu.dimension_semantics<parallel>, #tpu.dimension_semantics<parallel>, #tpu.dimension_semantics<arbitrary>], iteration_bounds = array<i64: 1, 1, 1>, scalar_prefetch = 0 : i64, scratch_operands = 1 : i64, tpu.core_type = #tpu.core_type<tc>, window_params = [{transform_indices = @transform_0, window_bounds = array<i64: 8, 128>}, {transform_indices = @transform_1, window_bounds = array<i64: 128, 128>}, {transform_indices = @transform_2, window_bounds = array<i64: 1, 128>}, {transform_indices = @transform_3, window_bounds = array<i64: 8, 128>}]} {
    %c0 = arith.constant 0 : index
    %c0_0 = arith.constant 0 : index
    %0 = vector.load %arg3[%c0, %c0_0] : memref<8x128xbf16, #tpu.memory_space<vmem>>, vector<8x128xbf16>
    %c0_1 = arith.constant 0 : index
    %c0_2 = arith.constant 0 : index
    %1 = vector.load %arg4[%c0_1, %c0_2] : memref<128x128xbf16, #tpu.memory_space<vmem>>, vector<128x128xbf16>
    %cst = arith.constant dense<0.000000e+00> : vector<8x128xf32>
    %2 = tpu.matmul %0, %1, %cst {dimension_numbers = #tpu.dot_dimension_numbers<[1], [0], [0], [1], [0, 0, 1, 1], [], []>} : vector<8x128xbf16>, vector<128x128xbf16>, vector<8x128xf32> -> vector<8x128xf32>
    %c0_i32 = arith.constant 0 : i32
    %3 = arith.cmpi eq, %arg2, %c0_i32 : i32
    %4 = arith.extui %3 : i1 to i32
    %c0_i32_3 = arith.constant 0 : i32
    %5 = arith.cmpi ne, %4, %c0_i32_3 : i32
    scf.if %5 {
      %c0_8 = arith.constant 0 : index
      %c0_9 = arith.constant 0 : index
      %12 = vector.load %arg7[%c0_8, %c0_9] : memref<8x128xf32, #tpu.memory_space<vmem>>, vector<8x128xf32>
      tpu.vector_store %arg7[%c0_8, %c0_9], %2 {strides = array<i32>} : memref<8x128xf32, #tpu.memory_space<vmem>>, vector<8x128xf32>,
    } else {
    }
    %c0_i32_4 = arith.constant 0 : i32
    %6 = arith.cmpi sgt, %arg2, %c0_i32_4 : i32
    %7 = arith.extui %6 : i1 to i32
    %c0_i32_5 = arith.constant 0 : i32
    %8 = arith.cmpi ne, %7, %c0_i32_5 : i32
    scf.if %8 {
      %c0_8 = arith.constant 0 : index
      %c0_9 = arith.constant 0 : index
      %12 = vector.load %arg7[%c0_8, %c0_9] : memref<8x128xf32, #tpu.memory_space<vmem>>, vector<8x128xf32>
      %13 = arith.addf %12, %2 : vector<8x128xf32>
      %c0_10 = arith.constant 0 : index
      %c0_11 = arith.constant 0 : index
      %14 = vector.load %arg7[%c0_10, %c0_11] : memref<8x128xf32, #tpu.memory_space<vmem>>, vector<8x128xf32>
      tpu.vector_store %arg7[%c0_10, %c0_11], %13 {strides = array<i32>} : memref<8x128xf32, #tpu.memory_space<vmem>>, vector<8x128xf32>,
    } else {
    }
    %c0_i32_6 = arith.constant 0 : i32
    %9 = arith.cmpi eq, %arg2, %c0_i32_6 : i32
    %10 = arith.extui %9 : i1 to i32
    %c0_i32_7 = arith.constant 0 : i32
    %11 = arith.cmpi ne, %10, %c0_i32_7 : i32
    scf.if %11 {
      %c0_8 = arith.constant 0 : index
      %c0_9 = arith.constant 0 : index
      %12 = vector.load %arg7[%c0_8, %c0_9] : memref<8x128xf32, #tpu.memory_space<vmem>>, vector<8x128xf32>
      %c0_10 = arith.constant 0 : index
      %c0_11 = arith.constant 0 : index
      %13 = vector.load %arg5[%c0_10, %c0_11] : memref<1x128xf32, #tpu.memory_space<vmem>>, vector<1x128xf32>
      %14 = vector.broadcast %13 : vector<1x128xf32> to vector<8x128xf32>
      %15 = arith.addf %12, %14 : vector<8x128xf32>
      %c0_12 = arith.constant 0 : index
      %c0_13 = arith.constant 0 : index
      %16 = vector.load %arg6[%c0_12, %c0_13] : memref<8x128xf32, #tpu.memory_space<vmem>>, vector<8x128xf32>
      tpu.vector_store %arg6[%c0_12, %c0_13], %15 {strides = array<i32>} : memref<8x128xf32, #tpu.memory_space<vmem>>, vector<8x128xf32>,
    } else {
    }
    return
  }
  func.func @transform_0(%arg0: i32, %arg1: i32, %arg2: i32) -> (i32, i32) {
    %c0_i32 = arith.constant 0 : i32
    return %arg0, %arg2 : i32, i32
  }
  func.func @transform_1(%arg0: i32, %arg1: i32, %arg2: i32) -> (i32, i32) {
    %c0_i32 = arith.constant 0 : i32
    return %arg2, %arg1 : i32, i32
  }
  func.func @transform_2(%arg0: i32, %arg1: i32, %arg2: i32) -> (i32, i32) {
    %c0_i32 = arith.constant 0 : i32
    %c0_i32_0 = arith.constant 0 : i32
    return %c0_i32, %arg1 : i32, i32
  }
  func.func @transform_3(%arg0: i32, %arg1: i32, %arg2: i32) -> (i32, i32) {
    %c0_i32 = arith.constant 0 : i32
    return %arg0, %arg1 : i32, i32
  }
}

</mosaic_0001>

<bundles_post_ra>
// kernel: linearQ_forward.1
= control target key start
LH: loop header
LB: loop body
LE: loop exit
PB: predicated region body
PF: predicated region fallthrough
CT: control target
= control target key end

     0   :  { %v233_v1 = vmov 0.0   ;;  %vm234_vm0 = vmmov 0   ;;  %s298_s0 = inlined_call_operand.vmem [shape: bf16[8,128], index: 0, kind: input, shape index: {}]   ;;  %s299_s1 = inlined_call_operand.vmem [shape: bf16[128,128], index: 1, kind: input, shape index: {}]   ;;  %s300_s2 = inlined_call_operand.vmem [shape: f32[1,128], index: 2, kind: input, shape index: {}]   ;;  %s301_s3 = inlined_call_operand.hbm [shape: f32[8,128], index: 3, kind: output, shape index: {}]  }
   0x1   :  { %v201_v0 = vld [vmem:[%s299_s1] sm:$0xff]   ;;  %178 = vmatprep.subr.bf16.mxu0 %v233_v1  ;;  %v202_v2 = vld [vmem:[%s299_s1 + $0x8] sm:$0xff]   ;;  %194 = vmatprep.mubr.msk.bf16.mxu0 %vm234_vm0, %v233_v1  ;;  %v203_v3 = vld [vmem:[%s299_s1 + $0x10] sm:$0xff]  }
   0x2   :  { %179 = vmatpush3.bf16.msra.mxu0 %v201_v0 }
   0x3   :  { %180 = vmatprep.subr.bf16.mxu0 %v233_v1 }
   0x6   :  { %181 = vmatpush3.bf16.msra.mxu0 %v202_v2 }
   0x7   :  { %182 = vmatprep.subr.bf16.mxu0 %v233_v1 }
   0x8   :  { %8 = vsyncpa [#allocation4], 0  ;;  %v204_v4 = vld [vmem:[%s299_s1 + $0x18] sm:$0xff]   ;;  %v205_v5 = vld [vmem:[%s299_s1 + $0x20] sm:$0xff]   ;;  %s235_s5 = smov [#allocation3]  }
   0x9   :  { %v206_v6 = vld [vmem:[%s299_s1 + $0x28] sm:$0xff]   ;;  %v207_v7 = vld [vmem:[%s299_s1 + $0x30] sm:$0xff]   ;;  %v208_v8 = vld [vmem:[%s299_s1 + $0x38] sm:$0xff]   ;;  %s152_s6 = sshll.u32 %s235_s5, 4  ;;  %s153_s6 = int_to_ptr.vmem [resolvable:$true] %s152_s6 }
   0xa   :  { %183 = vmatpush3.bf16.msra.mxu0 %v203_v3  ;;  %v16_v9 = vld [vmem:[%s298_s0] sm:$0xf]  ;;  %s209_s1 = scalar_lea.vmem %s153_s6, 128  ;;  %p214_p1 = scmp.lt.s32.totalorder %s153_s6, %s153_s6 }
   0xb   :  { %184 = vmatprep.subr.bf16.mxu0 %v233_v1  ;;  %v168_v10 = vld [vmem:[%s300_s2] ss:$0 sm:$0xff]  ;;  %p210_p0 = scmp.ne.s32.totalorder %s153_s6, %s209_s1  ;;  %p215_p2 = scmp.lt.s32.totalorder %s209_s1, %s209_s1 }
   0xd   :  { %p216_p3 = por %p215_p2, %p214_p1 }
   0xe   :  { %185 = vmatpush3.bf16.msra.mxu0 %v204_v4 }
   0xf   :  { %186 = vmatprep.subr.bf16.mxu0 %v233_v1  ;;  %p217_p4 = pnand %p216_p3, %p210_p0 }
  0x12   :  { %187 = vmatpush3.bf16.msra.mxu0 %v205_v5 }
  0x13   :  { %188 = vmatprep.subr.bf16.mxu0 %v233_v1 }
  0x16   :  { %189 = vmatpush3.bf16.msra.mxu0 %v206_v6 }
  0x17   :  { %190 = vmatprep.subr.bf16.mxu0 %v233_v1 }
  0x1a   :  { %191 = vmatpush3.bf16.msra.mxu0 %v207_v7 }
  0x1b   :  { %192 = vmatprep.subr.bf16.mxu0 %v233_v1 }
  0x1e   :  { %193 = vmatpush3.bf16.msra.mxu0 %v208_v8 }
  0x21   :  { %195 = vmatmul.mubr.bf16.vlgmr.msra.gmra.mrb[0].mxu0 %v16_v9 }
  0xf4   :  { %v115_v11 = vpop.f32.mrb[0].mxu0 }
  0xf5   :  { %v144_v12 = vadd.f32 %v168_v10, %v115_v11  ;;  %v196_v13 = vpop.f32.mrb[1].mxu0 }
  0xf6   :  { %v118_v14 = vpop.f32.mrb[2].mxu0 }
  0xf7   :  { %145 = vst [vmem:[#allocation3] sm:$0xff] %v144_v12  ;;  %v197_v15 = vpop.f32.mrb[3].mxu0 }
  0xf8   :  { %220 = shalt.err (!%p217_p4)
}
  0xf9   :  { %s221_s2 = scalar_lea.hbm %s301_s3, 128 }
  0xfa   :  { %p222_p5 = scmp.ne.s32.totalorder %s301_s3, %s221_s2  ;;  %p225_p6 = scmp.lt.u32.totalorder %s221_s2, %s301_s3 }
  0xfc   :  { %p227_p7 = pnand %p225_p6, %p222_p5 }
  0xfe   :  { %230 = shalt.err (!%p227_p7)
}
  0xff   :  { %155 = dma.vmem_to_hbm [thread:$0]  %s153_s6, 128, %s301_s3, [#allocation4]  }
 0x100   :  { %231 = dma.done.wait [#allocation4], 128  }
 0x101   :  { %232 = vsyncadd [#allocation4], 4294967168 }
 0x102   :  { %159 = vsyncpa [#allocation4], 1 }

</bundles_post_ra>
